<compile_context>
chip_gen: v7x
topology: tpu7x:2x2x1
jax: 0.10.0
libtpu: 0.0.40
codegen_flags: <defaults>
</compile_context>

<pallas_src>
import math

import jax
import jax.numpy as jnp
from jax.experimental import pallas as pl
from jax.experimental.pallas import tpu as pltpu


def _get_pad(size: int, multiple: int):
    new_size = math.ceil(size / multiple) * multiple
    pad = new_size - size
    left = pad // 2
    right = pad - left
    return left, right


def _cdiv(a: int, b: int) -> int:
    return -(-a // b)


def _round_up(a: int, b: int) -> int:
    return _cdiv(a, b) * b


def _vmem_capacity_bytes():
    """Best-effort physical VMEM capacity (bytes, per TensorCore)."""
    try:
        info = pltpu.get_tpu_info()
    except Exception:
        return None
    for name in ("vmem_capacity_bytes", "vmem_size_bytes", "vmem_bytes"):
        v = getattr(info, name, None)
        if isinstance(v, int) and v > 0:
            return v
    return None


def _budgets():
    """(double-buffered working-set budget, vmem_limit_bytes), generation-gated."""
    cap = _vmem_capacity_bytes()
    if cap is not None and cap > 64 * 1024 * 1024:
        # v5e / v6e: 128 MiB VMEM -> allow longer back-to-back DMAs.
        return 32 * 1024 * 1024, 64 * 1024 * 1024
    # v7x-class (64 MiB physical per TC) or unknown: stay conservative.
    return 16 * 1024 * 1024, 32 * 1024 * 1024


def _pick_block_rows(M: int, bytes_per_row: int, ws_budget: int,
                     target_steps: int = 8) -> int:
    """Images per grid step: fit the double-buffered working set in `ws_budget`,
    aim for ~`target_steps` grid steps (pipelining + both v7x TensorCores),
    keep each block >= ~1 MiB when possible, and balance the tail."""
    bytes_per_row = max(1, bytes_per_row)
    b_budget = max(1, ws_budget // (2 * bytes_per_row))   # 2x: double-buffered
    b_floor = max(1, (1 << 20) // bytes_per_row)           # ~1 MiB per block
    b_cap = max(1, _cdiv(M, target_steps))                 # ~target_steps steps
    B = min(b_budget, M, max(b_cap, min(b_floor, M)))
    if M >= 2 and B >= M:
        B = _cdiv(M, 2)            # at least 2 steps so v7x can use both TCs
    steps = _cdiv(M, B)
    B = _cdiv(M, steps)            # near-equal steps (no near-empty tail)
    return max(1, min(B, M))


def center_padding(x: jax.Array, multiple: int) -> jax.Array:
    """Center-pad H and W of an NCHW tensor to multiples of `multiple`."""
    # TODO(synk): only the common 4-D NCHW case is implemented as a kernel
    # (the torch module also accepts other ranks).
    assert x.ndim == 4, "kernel implements the 4-D (N, C, H, W) case"
    N, C, H, W = x.shape
    pad_t, pad_b = _get_pad(H, multiple)
    pad_l, pad_r = _get_pad(W, multiple)

    # Static fast path: pads are Python ints, so this is free at trace time.
    if pad_t == 0 and pad_b == 0 and pad_l == 0 and pad_r == 0:
        return x

    Hn = H + pad_t + pad_b
    Wn = W + pad_l + pad_r
    M = N * C                                   # fuse N and C
    itemsize = x.dtype.itemsize
    sublane = max(8, 32 // itemsize)            # 8 f32, 16 bf16, 32 int8/fp8
    ws_budget, vmem_limit = _budgets()

    if pad_l == 0 and pad_r == 0:
        # -------- Lane-dense fast path: only H needs padding. --------
        # Flatten the spatial dims so the block minor axis is H*W / Hn*W
        # (>= 128 wide for realistic maps): loads/stores are lane-dense and
        # the interior is a single long contiguous row slice.
        HW = H * W
        HnW = Hn * W
        x2 = x.reshape(M, HW)
        in_row = _round_up(HW, 128) * itemsize
        out_row = _round_up(HnW, 128) * itemsize
        B = _pick_block_rows(M, in_row + out_row, ws_budget)
        if B < M:
            # 2nd-minor dim of a 2-D block must be a sublane multiple (or full).
            B = min(M, _round_up(B, sublane))
        grid = (_cdiv(M, B),)
        off = pad_t * W

        def kernel(x_ref, o_ref):
            bb = o_ref.shape[0]
            dt = o_ref.dtype
            # Every output element is written exactly once.
            if pad_t:
                o_ref[:, 0:off] = jnp.zeros((bb, off), dt)
            if pad_b:
                o_ref[:, off + HW:HnW] = jnp.zeros((bb, pad_b * W), dt)
            o_ref[:, off:off + HW] = x_ref[...]

        out2 = pl.pallas_call(
            kernel,
            out_shape=jax.ShapeDtypeStruct((M, HnW), x.dtype),
            grid=grid,
            in_specs=[pl.BlockSpec((B, HW), lambda i: (i, 0))],
            out_specs=pl.BlockSpec((B, HnW), lambda i: (i, 0)),
            compiler_params=pltpu.CompilerParams(
                dimension_semantics=("parallel",),
                vmem_limit_bytes=vmem_limit,
            ),
            cost_estimate=pl.CostEstimate(
                flops=0, transcendentals=0,
                bytes_accessed=M * HW * itemsize + M * HnW * itemsize),
        )(x2)
        return out2.reshape(N, C, Hn, W)

    # -------- General case: W (and possibly H) needs padding. --------
    # Keep (B, H, W) -> (B, Hn, Wn) blocks covering the full spatial dims so
    # both HBM DMAs are one long contiguous run per block. Exactly-once
    # writes: border strips + one interior store.
    x2 = x.reshape(M, H, W)
    in_img = _round_up(H, sublane) * _round_up(W, 128) * itemsize
    out_img = _round_up(Hn, sublane) * _round_up(Wn, 128) * itemsize
    B = _pick_block_rows(M, in_img + out_img, ws_budget)
    grid = (_cdiv(M, B),)

    def kernel(x_ref, o_ref):
        bb = o_ref.shape[0]
        dt = o_ref.dtype
        if pad_t:
            o_ref[:, 0:pad_t, :] = jnp.zeros((bb, pad_t, Wn), dt)
        if pad_b:
            o_ref[:, pad_t + H:Hn, :] = jnp.zeros((bb, pad_b, Wn), dt)
        if pad_l:
            o_ref[:, pad_t:pad_t + H, 0:pad_l] = jnp.zeros((bb, H, pad_l), dt)
        if pad_r:
            o_ref[:, pad_t:pad_t + H, pad_l + W:Wn] = jnp.zeros((bb, H, pad_r), dt)
        o_ref[:, pad_t:pad_t + H, pad_l:pad_l + W] = x_ref[...]

    out2 = pl.pallas_call(
        kernel,
        out_shape=jax.ShapeDtypeStruct((M, Hn, Wn), x.dtype),
        grid=grid,
        in_specs=[pl.BlockSpec((B, H, W), lambda i: (i, 0, 0))],
        out_specs=pl.BlockSpec((B, Hn, Wn), lambda i: (i, 0, 0)),
        compiler_params=pltpu.CompilerParams(
            dimension_semantics=("parallel",),
            vmem_limit_bytes=vmem_limit,
        ),
        cost_estimate=pl.CostEstimate(
            flops=0, transcendentals=0,
            bytes_accessed=M * H * W * itemsize + M * Hn * Wn * itemsize),
    )(x2)
    return out2.reshape(N, C, Hn, Wn)


if __name__ == "__main__":
    key = jax.random.PRNGKey(0)

    # 1) General path: both H and W need padding (16 -> 21, split (2, 3)).
    N, C, H, W = 2, 4, 16, 16
    multiple = 7
    x = jax.random.normal(key, (N, C, H, W), dtype=jnp.float32)
    out = jax.block_until_ready(center_padding(x, multiple))
    pt, pb = _get_pad(H, multiple)
    wl, wr = _get_pad(W, multiple)
    ref = jnp.pad(x, ((0, 0), (0, 0), (pt, pb), (wl, wr)))
    assert out.shape == ref.shape, (out.shape, ref.shape)
    assert out.dtype == x.dtype
    assert jnp.array_equal(out, ref), "mismatch vs reference padding (general)"

    # 2) Lane-dense H-only path (W already a multiple), bf16.
    xb = jax.random.normal(key, (2, 3, 12, 16), dtype=jnp.bfloat16)
    outb = jax.block_until_ready(center_padding(xb, 8))
    refb = jnp.pad(xb, ((0, 0), (0, 0), (2, 2), (0, 0)))
    assert outb.shape == refb.shape and outb.dtype == xb.dtype
    assert jnp.array_equal(outb, refb), "mismatch vs reference padding (H-only)"

    # 3) Static no-pad fast path: input returned unchanged.
    assert center_padding(x, 8) is x

    print("KERNEL_OK")
</pallas_src>

<mosaic_0001>
module attributes {stable_mosaic.version = 11 : i64} {
  func.func @kernel(%arg0: i32, %arg1: memref<4x16x16xf32, #tpu.memory_space<vmem>>, %arg2: memref<4x21x21xf32, #tpu.memory_space<vmem>>) attributes {dimension_semantics = [#tpu.dimension_semantics<parallel>], iteration_bounds = array<i64: 2>, scalar_prefetch = 0 : i64, scratch_operands = 0 : i64, tpu.core_type = #tpu.core_type<tc>, window_params = [{transform_indices = @transform_0, window_bounds = array<i64: 4, 16, 16>}, {transform_indices = @transform_1, window_bounds = array<i64: 4, 21, 21>}]} {
    %cst = arith.constant 0.000000e+00 : f32
    %0 = vector.broadcast %cst : f32 to vector<4x2x21xf32>
    %c0 = arith.constant 0 : index
    %c0_0 = arith.constant 0 : index
    %c0_1 = arith.constant 0 : index
    %1 = vector.load %arg2[%c0, %c0_0, %c0_1] : memref<4x21x21xf32, #tpu.memory_space<vmem>>, vector<4x2x21xf32>
    tpu.vector_store %arg2[%c0, %c0_0, %c0_1], %0 {strides = array<i32>} : memref<4x21x21xf32, #tpu.memory_space<vmem>>, vector<4x2x21xf32>,
    %cst_2 = arith.constant 0.000000e+00 : f32
    %2 = vector.broadcast %cst_2 : f32 to vector<4x3x21xf32>
    %c0_3 = arith.constant 0 : index
    %c18 = arith.constant 18 : index
    %c0_4 = arith.constant 0 : index
    %3 = vector.load %arg2[%c0_3, %c18, %c0_4] : memref<4x21x21xf32, #tpu.memory_space<vmem>>, vector<4x3x21xf32>
    tpu.vector_store %arg2[%c0_3, %c18, %c0_4], %2 {strides = array<i32>} : memref<4x21x21xf32, #tpu.memory_space<vmem>>, vector<4x3x21xf32>,
    %cst_5 = arith.constant 0.000000e+00 : f32
    %4 = vector.broadcast %cst_5 : f32 to vector<4x16x2xf32>
    %c0_6 = arith.constant 0 : index
    %c2 = arith.constant 2 : index
    %c0_7 = arith.constant 0 : index
    %5 = vector.load %arg2[%c0_6, %c2, %c0_7] : memref<4x21x21xf32, #tpu.memory_space<vmem>>, vector<4x16x2xf32>
    tpu.vector_store %arg2[%c0_6, %c2, %c0_7], %4 {strides = array<i32>} : memref<4x21x21xf32, #tpu.memory_space<vmem>>, vector<4x16x2xf32>,
    %cst_8 = arith.constant 0.000000e+00 : f32
    %6 = vector.broadcast %cst_8 : f32 to vector<4x16x3xf32>
    %c0_9 = arith.constant 0 : index
    %c2_10 = arith.constant 2 : index
    %c18_11 = arith.constant 18 : index
    %7 = vector.load %arg2[%c0_9, %c2_10, %c18_11] : memref<4x21x21xf32, #tpu.memory_space<vmem>>, vector<4x16x3xf32>
    tpu.vector_store %arg2[%c0_9, %c2_10, %c18_11], %6 {strides = array<i32>} : memref<4x21x21xf32, #tpu.memory_space<vmem>>, vector<4x16x3xf32>,
    %c0_12 = arith.constant 0 : index
    %c0_13 = arith.constant 0 : index
    %c0_14 = arith.constant 0 : index
    %8 = vector.load %arg1[%c0_12, %c0_13, %c0_14] : memref<4x16x16xf32, #tpu.memory_space<vmem>>, vector<4x16x16xf32>
    %c0_15 = arith.constant 0 : index
    %c2_16 = arith.constant 2 : index
    %c2_17 = arith.constant 2 : index
    %9 = vector.load %arg2[%c0_15, %c2_16, %c2_17] : memref<4x21x21xf32, #tpu.memory_space<vmem>>, vector<4x16x16xf32>
    tpu.vector_store %arg2[%c0_15, %c2_16, %c2_17], %8 {strides = array<i32>} : memref<4x21x21xf32, #tpu.memory_space<vmem>>, vector<4x16x16xf32>,
    return
  }
  func.func @transform_0(%arg0: i32) -> (i32, i32, i32) {
    %c0_i32 = arith.constant 0 : i32
    %c0_i32_0 = arith.constant 0 : i32
    %c0_i32_1 = arith.constant 0 : i32
    return %arg0, %c0_i32, %c0_i32_0 : i32, i32, i32
  }
  func.func @transform_1(%arg0: i32) -> (i32, i32, i32) {
    %c0_i32 = arith.constant 0 : i32
    %c0_i32_0 = arith.constant 0 : i32
    %c0_i32_1 = arith.constant 0 : i32
    return %arg0, %c0_i32, %c0_i32_0 : i32, i32, i32
  }
}

</mosaic_0001>

<bundles_post_ra>
// kernel: tpu_custom_call.1
= control target key start
LH: loop header
LB: loop body
LE: loop exit
PB: predicated region body
PF: predicated region fallthrough
CT: control target
= control target key end

     0   :  { %6 = vsyncpa [#allocation3], 0  ;;  %s620_s0 = inlined_call_operand.hbm [shape: f32[8,16,16], index: 0, kind: input, shape index: {}]   ;;  %s621_s1 = inlined_call_operand.vmem [shape: f32[8,21,21], index: 1, kind: output, shape index: {}]  }
   0x1   :  { %8 = vsyncpa [#allocation3 + $0x1], 0  ;;  %s429_s6 = smov 0   ;;  %s431_s7 = smov 0  }
   0x2   :  { %s433_s8 = smov 0   ;;  %s435_s9 = smov 0  }
   0x3 LB: > { %s288_s10 = sadd.s32 4294967295, %s412_s9   ;;  %s449_s11 = sadd.s32 1, %s412_s9   ;;  %s412_s9 = sphi %s435_s9, %s628_s9   ;;  %s408_s8 = sphi %s433_s8, %s627_s8   ;;  %s404_s7 = sphi %s431_s7, %s626_s7   ;;  %s400_s6 = sphi %s429_s6, %s625_s6  }
   0x4   : > { %s18_s12 = ssub.s32 %s412_s9, %s449_s11  ;;  %s21_s13 = sadd.s32 1, %s408_s8 }
   0x5   : > { %p19_p0 = scmp.eq.s32.totalorder %s18_s12, 0  ;;  %p28_p1 = scmp.ne.s32.totalorder %s408_s8, %s404_s7 }
   0x6   : > { %p29_p2 = scmp.eq.s32.totalorder %s412_s9, 0  ;;  %p34_p3 = scmp.ne.s32.totalorder %s404_s7, %s400_s6 }
   0x7   : > { %s459_s14 = scalar_select %p19_p0, %s408_s8, %s21_s13  }
   0x8   : > { %p30_p4 = por %p29_p2, %p28_p1  ;;  %p35_p5 = scmp.eq.s32.totalorder %s288_s10, 0 }
   0x9   : > { %p311_p6 = scmp.lt.s32.totalorder %s412_s9, 2  ;;  %s84_s16 = sand.u32 1, %s408_s8  }
   0xa   : > { %p464_p7 = por %p35_p5, %p34_p3  ;;  %s292_s17 = sshll.u32 %s84_s16, 6 }
   0xb   : > { %s303_s18 = sshll.u32 %s412_s9, 10  ;;  %s88_s22 = scalar_lea.vmem [#allocation2], %s292_s17 }
   0xc   : > { %s473_s21 = scalar_lea.hbm %s620_s0, %s303_s18  ;;  %s96_s23 = sshll.u32 %s88_s22, 4  ;;  %s475_s23 = int_to_ptr.vmem [resolvable:$true] %s96_s23 }
   0xd   : > { %p477_p8 = pnand %p311_p6, %p30_p4  ;;  %s482_s25 = scalar_lea.sflag [#allocation3], %s84_s16 }
   0xe   : > { %s348_s26 = scalar_lea.hbm %s473_s21, 1024  ;;  %s353_s29 = scalar_lea.hbm %s620_s0, 2048 }
   0xf   : > { %p349_p10 = scmp.ne.s32.totalorder %s473_s21, %s348_s26  ;;  %p350_p11 = pneg %p477_p8 }
  0x10   : > { %p354_p0 = scmp.lt.u32.totalorder %s473_s21, %s620_s0  ;;  %p355_p1 = scmp.lt.u32.totalorder %s353_s29, %s348_s26 }
  0x11   : > { %p351_p12 = pnand %p350_p11, %p349_p10  ;;  %p357_p3 = scmp.lt.u32.totalorder %s348_s26, %s473_s21 }
  0x12   : > { %p356_p2 = por %p355_p1, %p354_p0 }
  0x13   : > { %p352_p13 = pneg %p351_p12 }
  0x14   : > { %p358_p4 = por %p357_p3, %p356_p2 }
  0x16   : > { %p359_p5 = pnand %p358_p4, %p352_p13 }
  0x18   : > { %362 = shalt.err (!%p359_p5)
}
  0x19   : > { %s363_s3 = scalar_lea.vmem %s475_s23, 1024  ;;  %s414_s4 = smov [#allocation2]  }
  0x1a   : > { %p364_p6 = scmp.ne.s32.totalorder %s475_s23, %s363_s3  ;;  %s368_s5 = sshll.u32 %s414_s4, 4  ;;  %s369_s5 = int_to_ptr.vmem [resolvable:$false] %s368_s5 }
  0x1b   : > { %s370_s6 = scalar_lea.vmem %s369_s5, 2048  ;;  %p371_p9 = scmp.lt.s32.totalorder %s475_s23, %s369_s5 }
  0x1c   : > { %p366_p10 = pnand %p364_p6, %p350_p11  ;;  %p372_p0 = scmp.lt.s32.totalorder %s370_s6, %s363_s3 }
  0x1e   : > { %p367_p12 = pneg %p366_p10  ;;  %p373_p1 = por %p372_p0, %p371_p9 }
  0x20   : > { %p374_p2 = pnand %p373_p1, %p367_p12 }
  0x22   : > { %377 = shalt.err (!%p374_p2)
}
  0x23   : > { %s415_s12 = smov 128   ;;  %s416_s13 = smov 8  }
  0x24   : > { %310 = dma.hbm_to_vmem [thread:$0]  (!%p477_p8), %s473_s21, 1024, %s475_s23, %s482_s25, %s415_s12, %s415_s12, %s416_s13  }
  0x25   : > { %p104_p11 = scmp.lt.s32.totalorder %s412_s9, 3  ;;  %p624_p13 = scmp.ge.s32.totalorder %s412_s9, 1 }
  0x27   : > { %p105_p3 = pnand %p624_p13, %p104_p11 }
  0x28   : > { %s110_s16 = sand.u32 (!%p105_p3), 1, %s404_s7  }
  0x29   : > { %108 = sbr.rel (%p105_p3) target bundleno = 179 (0xb3), region = 24  ;;  %s297_s17 = sshll.u32 (!%p105_p3), %s110_s16, 6 }
  0x2a   : > { %s111_s18 = scalar_lea.sflag (!%p105_p3), [#allocation3], %s110_s16  ;;  %s514_s19 = scalar_lea.vmem (!%p105_p3), [#allocation2], %s297_s17 }
  0x30   : > { %395 = dma.done.wait (%p464_p7), %s111_s18, 1024  }
  0x31   : > { %397 = vsyncadd (%p464_p7), %s111_s18, 4294966272  ;;  %s298_s20 = sshll.u32 %s288_s10, 2  ;;  %vm142_vm0 = vcmask 164864   ;;  %vm147_vm1 = vcmask 165888   ;;  %vm152_vm2 = vcmask 15360   ;;  %v172_v0 = vld [vmem:[%s514_s19 + $0x10] sm:$0xff] }
  0x32   : > { %p136_p8 = scmp.lt.s32.totalorder %s298_s20, 7  ;;  %v170_v1 = vld [vmem:[%s514_s19] sm:$0xff]  ;;  %v417_v2 = vmov 0.0   ;;  %s418_s9 = smov 2   ;;  %v173_v3 = vld [vmem:[%s514_s19 + $0x18] sm:$0xff]  ;;  %v171_v4 = vld [vmem:[%s514_s19 + $0x8] sm:$0xff] }
  0x33   : > { %190 = vrot.lane.b32.xlu1 %v172_v0, %s418_s9  ;;  %186 = vrot.lane.b32.xlu0 %v170_v1, %s418_s9  ;;  %vm161_vm3 = vcmask 171152   ;;  %v175_v5 = vld [vmem:[%s514_s19 + $0x28] sm:$0xff]  ;;  %v174_v6 = vld [vmem:[%s514_s19 + $0x20] sm:$0xff]  ;;  %vm210_vm4 = vcmask 146448  }
  0x34   : > { %s630_s20 = smov (!%p136_p8, %s298_s20), 7  ;;  %v177_v7 = vld [vmem:[%s514_s19 + $0x38] sm:$0xff]  ;;  %v176_v8 = vld [vmem:[%s514_s19 + $0x30] sm:$0xff] }
  0x35   : > { %s304_s21 = smul.u32 24, %s630_s20 }
  0x37   : > { %s525_s24 = scalar_lea.vmem %s621_s1, %s304_s21  ;;  %192 = vrot.lane.b32.xlu1 %v173_v3, %s418_s9  ;;  %188 = vrot.lane.b32.xlu0 %v171_v4, %s418_s9 }
  0x38   : > { %143 = vst.msk [vmem:[%s525_s24] sm:$0x3] %vm142_vm0, %v417_v2  ;;  %144 = vst.msk [vmem:[%s525_s24 + $0x18] sm:$0x3] %vm142_vm0, %v417_v2 }
  0x39   : > { %148 = vst.msk [vmem:[%s525_s24 + $0x12] sm:$0x7] %vm147_vm1, %v417_v2  ;;  %149 = vst.msk [vmem:[%s525_s24 + $0x2a] sm:$0x7] %vm147_vm1, %v417_v2 }
  0x3a   : > { %153 = vst.msk [vmem:[%s525_s24 + $0x2] sm:$0xff] %vm152_vm2, %v417_v2  ;;  %154 = vst.msk [vmem:[%s525_s24 + $0xa] sm:$0xff] %vm152_vm2, %v417_v2 }
  0x3b   : > { %155 = vst.msk [vmem:[%s525_s24 + $0x1a] sm:$0xff] %vm152_vm2, %v417_v2  ;;  %156 = vst.msk [vmem:[%s525_s24 + $0x22] sm:$0xff] %vm152_vm2, %v417_v2  ;;  %196 = vrot.lane.b32.xlu1 %v175_v5, %s418_s9  ;;  %194 = vrot.lane.b32.xlu0 %v174_v6, %s418_s9 }
  0x3c   : > { %145 = vst.msk [vmem:[%s525_s24 + $0x30] sm:$0x3] %vm142_vm0, %v417_v2  ;;  %146 = vst.msk [vmem:[%s525_s24 + $0x48] sm:$0x3] %vm142_vm0, %v417_v2 }
  0x3d   : > { %150 = vst.msk [vmem:[%s525_s24 + $0x42] sm:$0x7] %vm147_vm1, %v417_v2  ;;  %151 = vst.msk [vmem:[%s525_s24 + $0x5a] sm:$0x7] %vm147_vm1, %v417_v2 }
  0x3e   : > { %157 = vst.msk [vmem:[%s525_s24 + $0x32] sm:$0xff] %vm152_vm2, %v417_v2  ;;  %158 = vst.msk [vmem:[%s525_s24 + $0x3a] sm:$0xff] %vm152_vm2, %v417_v2 }
  0x3f   : > { %159 = vst.msk [vmem:[%s525_s24 + $0x4a] sm:$0xff] %vm152_vm2, %v417_v2  ;;  %160 = vst.msk [vmem:[%s525_s24 + $0x52] sm:$0xff] %vm152_vm2, %v417_v2  ;;  %200 = vrot.lane.b32.xlu1 %v177_v7, %s418_s9  ;;  %198 = vrot.lane.b32.xlu0 %v176_v8, %s418_s9 }
  0x40   : > { %162 = vst.msk [vmem:[%s525_s24 + $0x2] sm:$0xff] %vm161_vm3, %v417_v2  ;;  %163 = vst.msk [vmem:[%s525_s24 + $0xa] sm:$0xff] %vm161_vm3, %v417_v2 }
  0x41   : > { %164 = vst.msk [vmem:[%s525_s24 + $0x1a] sm:$0xff] %vm161_vm3, %v417_v2  ;;  %165 = vst.msk [vmem:[%s525_s24 + $0x22] sm:$0xff] %vm161_vm3, %v417_v2 }
  0x42   : > { %166 = vst.msk [vmem:[%s525_s24 + $0x32] sm:$0xff] %vm161_vm3, %v417_v2  ;;  %167 = vst.msk [vmem:[%s525_s24 + $0x3a] sm:$0xff] %vm161_vm3, %v417_v2 }
  0x43   : > { %168 = vst.msk [vmem:[%s525_s24 + $0x4a] sm:$0xff] %vm161_vm3, %v417_v2  ;;  %169 = vst.msk [vmem:[%s525_s24 + $0x52] sm:$0xff] %vm161_vm3, %v417_v2 }
  0xa5   : > { %v191_v9 = vpop.permute.xlu1 %190  ;;  %v187_v10 = vpop.permute.xlu0 %186 }
  0xa6   : > { %211 = vst.msk [vmem:[%s525_s24 + $0x2] sm:$0xff] %vm210_vm4, %v187_v10  ;;  %213 = vst.msk [vmem:[%s525_s24 + $0x1a] sm:$0xff] %vm210_vm4, %v191_v9 }
  0xa9   : > { %v193_v11 = vpop.permute.xlu1 %192  ;;  %v189_v12 = vpop.permute.xlu0 %188 }
  0xaa   : > { %212 = vst.msk [vmem:[%s525_s24 + $0xa] sm:$0xff] %vm210_vm4, %v189_v12  ;;  %214 = vst.msk [vmem:[%s525_s24 + $0x22] sm:$0xff] %vm210_vm4, %v193_v11 }
  0xad   : > { %v197_v13 = vpop.permute.xlu1 %196  ;;  %v195_v14 = vpop.permute.xlu0 %194 }
  0xae   : > { %216 = vst.msk [vmem:[%s525_s24 + $0x3a] sm:$0xff] %vm210_vm4, %v197_v13  ;;  %215 = vst.msk [vmem:[%s525_s24 + $0x32] sm:$0xff] %vm210_vm4, %v195_v14 }
  0xb1   : > { %v201_v15 = vpop.permute.xlu1 %200  ;;  %v199_v16 = vpop.permute.xlu0 %198 }
  0xb2   : > { %218 = vst.msk [vmem:[%s525_s24 + $0x52] sm:$0xff] %vm210_vm4, %v201_v15  ;;  %217 = vst.msk [vmem:[%s525_s24 + $0x4a] sm:$0xff] %vm210_vm4, %v199_v16 }
  0xb3 PF: > { %p11_p7 = scmp.ge.s32.totalorder %s449_s11, 4   ;;  %s625_s6 = smov %s404_s7 }
  0xb4   : > { %s626_s7 = smov %s408_s8  ;;  %s627_s8 = smov %s459_s14 }
  0xb5   : > { %s628_s9 = smov %s449_s11  ;;  %13 = sbr.rel (!%p11_p7) target bundleno = 3 (0x3), region = 64 }
  0xbc   :  { %243 = vsyncpa [#allocation3], 1 }
  0xbd   :  { %245 = vsyncpa [#allocation3 + $0x1], 1 }

</bundles_post_ra>
